<compile_context>
chip_gen: v7x
topology: tpu7x:2x2x1
jax: 0.10.0
libtpu: 0.0.40
codegen_flags: <defaults>
</compile_context>

<pallas_src>
import functools

import jax
import jax.numpy as jnp
import numpy as np
from jax.experimental import pallas as pl
from jax.experimental.pallas import tpu as pltpu

# ----------------------------- configuration --------------------------------
BATCH = 8
INPUT_DIM = 16
DIM_CONTEXT = 12
HIDDEN_SIZES = (32, 32)
NUM_SEGMENTS = 4
OUTPUT_SIZE = 10                 # single output head (int -> single tensor returned)
OUT_PAD = 128                    # lane-dense padded output width
KW_PERCENT_ON = 0.25             # -> k = round(32 * 0.25) = 8 winners per row
WEIGHT_SPARSITY = 0.5
PREPROCESS_OUTPUT_DIM = 64       # preprocess_module_type='relu'

K_WINNERS = tuple(int(round(h * KW_PERCENT_ON)) for h in HIDDEN_SIZES)

# TODO(synk): representation_module ('relu' variant) not implemented; with the default
# module_type=None it is skipped in forward(), and the PyTorch code for the non-None
# path is itself broken (uses undefined self.input_size).


# ------------------------------- kernel -------------------------------------
def _dendritic_mlp_kernel(xc_ref, wp_ref, bp_ref,
                          w1_ref, b1_ref, w2_ref, b2_ref,
                          sd_ref, wo_ref, bo_ref, out_ref,
                          *, input_dim, hidden_sizes, num_segments, k_winners):
    f32 = jnp.float32
    xc = xc_ref[...].astype(f32)          # (BT, INPUT_DIM + DIM_CONTEXT)
    x = xc[:, :input_dim]                 # (BT, INPUT_DIM) static prefix slice

    # --- preprocess module: relu(Linear(cat([x, context], -1))) -------------
    ctx = jnp.dot(xc, wp_ref[...], preferred_element_type=f32) + bp_ref[...]
    ctx = jnp.maximum(ctx, 0.0)           # (BT, PREPROCESS_OUTPUT_DIM)

    # --- ALL dendrite pre-activations (both layers, all segments) -----------
    # one lane-dense (PREPROCESS_OUTPUT_DIM, 2*NUM_SEGMENTS*H) = (64, 256) matmul
    d_all = jnp.dot(ctx, sd_ref[...], preferred_element_type=f32)   # (BT, 256)

    def kwinners(v, k):
        # KWinners (eval; boost_strength=0, k_inference_factor=1.0):
        # threshold = k-th largest of each row, computed with k max+mask passes on the
        # (BT, H) tile; keep values >= threshold.
        # TODO(synk): exact ties among the top-k collapse to one max per pass (differs
        # from torch.topk only on exact float ties, which never occur for random data).
        remaining = v
        thresh = v
        for _ in range(k):
            thresh = jnp.max(remaining, axis=-1, keepdims=True)
            remaining = jnp.where(remaining >= thresh, -jnp.inf, remaining)
        return jnp.where(v >= thresh, v, 0.0)

    def dendritic_layer(h, w_ref, b_ref, d_layer, hdim, k):
        # Sparse linear (weights were zero-masked at init; forward is a dense matmul).
        y = jnp.dot(h, w_ref[...], preferred_element_type=f32) + b_ref[...]

        # Absolute-max gating over the num_segments static 32-lane slices (sign kept).
        sel = d_layer[:, :hdim]
        best = jnp.abs(sel)
        for s in range(1, num_segments):
            d = d_layer[:, s * hdim:(s + 1) * hdim]
            a = jnp.abs(d)
            take = a > best                 # keep earliest segment on exact ties
            sel = jnp.where(take, d, sel)
            best = jnp.where(take, a, best)

        gated = y * jax.nn.sigmoid(sel)
        return kwinners(gated, k)

    seg_w1 = num_segments * hidden_sizes[0]
    seg_w2 = num_segments * hidden_sizes[1]
    h = dendritic_layer(x, w1_ref, b1_ref, d_all[:, :seg_w1],
                        hidden_sizes[0], k_winners[0])
    h = dendritic_layer(h, w2_ref, b2_ref, d_all[:, seg_w1:seg_w1 + seg_w2],
                        hidden_sizes[1], k_winners[1])

    # --- output head (no output nonlinearity), lane-dense 128-wide store ----
    out_ref[...] = jnp.dot(h, wo_ref[...], preferred_element_type=f32) + bo_ref[...]


# ------------------------------- wrapper -------------------------------------
def custom_dendritic_mlp_forward(x, context, params):
    B = x.shape[0]
    # Batch tile: up to 256 rows per grid step (fills MXU rows on v6e/v7x); with B>256
    # the grid gets >=2 "parallel" steps so both v7x TensorCores are used.
    BT = min(B, 256)
    assert B % BT == 0 and BT % 8 == 0

    # concat([x, context]) once in the wrapper -> one preprocess matmul in the kernel.
    xc = jnp.concatenate([x, context], axis=-1)                     # (B, 28)

    # Pack dendrite segment weights of both layers into one lane-dense matrix:
    # (S, CTX, H) -> (CTX, S*H), then concat layers -> (CTX, 2*S*H) = (64, 256).
    def pack_segments(s):
        S, C, H = s.shape
        return jnp.transpose(s, (1, 0, 2)).reshape(C, S * H)

    sd = jnp.concatenate([pack_segments(params["s1"]),
                          pack_segments(params["s2"])], axis=-1)

    # Pad the output head to 128 columns (zeros) for an unmasked lane-dense store.
    wo = jnp.pad(params["wo"], ((0, 0), (0, OUT_PAD - OUTPUT_SIZE)))
    bo = jnp.pad(params["bo"], ((0, 0), (0, OUT_PAD - OUTPUT_SIZE)))

    def full_spec(arr):
        nd = arr.ndim
        return pl.BlockSpec(arr.shape, lambda i, _nd=nd: (0,) * _nd)

    in_specs = [
        pl.BlockSpec((BT, xc.shape[1]), lambda i: (i, 0)),          # [x, context]
        full_spec(params["wp"]), full_spec(params["bp"]),
        full_spec(params["w1"]), full_spec(params["b1"]),
        full_spec(params["w2"]), full_spec(params["b2"]),
        full_spec(sd), full_spec(wo), full_spec(bo),
    ]
    out_spec = pl.BlockSpec((BT, OUT_PAD), lambda i: (i, 0))

    kernel = functools.partial(_dendritic_mlp_kernel,
                               input_dim=INPUT_DIM,
                               hidden_sizes=HIDDEN_SIZES,
                               num_segments=NUM_SEGMENTS,
                               k_winners=K_WINNERS)

    out = pl.pallas_call(
        kernel,
        out_shape=jax.ShapeDtypeStruct((B, OUT_PAD), jnp.float32),
        grid=(B // BT,),
        in_specs=in_specs,
        out_specs=out_spec,
        compiler_params=pltpu.CompilerParams(dimension_semantics=("parallel",)),
    )(xc, params["wp"], params["bp"],
      params["w1"], params["b1"], params["w2"], params["b2"],
      sd, wo, bo)

    return out[:, :OUTPUT_SIZE]


# ------------------------- deterministic parameter init ----------------------
def _sparse_matrix(key, fan_in, fan_out, sparsity):
    kw, km = jax.random.split(key)
    w = jax.random.normal(kw, (fan_in, fan_out), jnp.float32) / np.sqrt(fan_in)
    mask = (jax.random.uniform(km, (fan_in, fan_out)) >= sparsity).astype(jnp.float32)
    return w * mask  # SparseWeights: fixed zero mask applied to the weights


def init_params(key):
    keys = jax.random.split(key, 12)
    p = {}
    # preprocess Linear(INPUT_DIM + DIM_CONTEXT -> PREPROCESS_OUTPUT_DIM)
    p["wp"] = _sparse_matrix(keys[0], INPUT_DIM + DIM_CONTEXT, PREPROCESS_OUTPUT_DIM,
                             WEIGHT_SPARSITY)
    p["bp"] = 0.1 * jax.random.normal(keys[1], (1, PREPROCESS_OUTPUT_DIM), jnp.float32)

    # dendritic hidden layers
    dims_in = (INPUT_DIM, HIDDEN_SIZES[0])
    for li, (din, h) in enumerate(zip(dims_in, HIDDEN_SIZES), start=1):
        p[f"w{li}"] = _sparse_matrix(keys[2 * li], din, h, WEIGHT_SPARSITY)
        p[f"b{li}"] = 0.1 * jax.random.normal(keys[2 * li + 1], (1, h), jnp.float32)
        # dendrite segment weights (num_segments, context_dim, hidden), sparse init.
        ks, km = jax.random.split(keys[2 * li + 5])
        s = jax.random.normal(ks, (NUM_SEGMENTS, PREPROCESS_OUTPUT_DIM, h),
                              jnp.float32) / np.sqrt(PREPROCESS_OUTPUT_DIM)
        smask = (jax.random.uniform(km, s.shape) >= WEIGHT_SPARSITY).astype(jnp.float32)
        p[f"s{li}"] = s * smask

    # output head
    p["wo"] = _sparse_matrix(keys[10], HIDDEN_SIZES[-1], OUTPUT_SIZE, WEIGHT_SPARSITY)
    p["bo"] = 0.1 * jax.random.normal(keys[11], (1, OUTPUT_SIZE), jnp.float32)
    return p


# ------------------------------ pure-JAX reference ---------------------------
def reference_forward(x, context, params):
    xc = jnp.concatenate([x, context], axis=-1)
    ctx = jnp.maximum(xc @ params["wp"] + params["bp"], 0.0)
    h = x
    for li, k in zip((1, 2), K_WINNERS):
        w, b, s = params[f"w{li}"], params[f"b{li}"], params[f"s{li}"]
        y = h @ w + b
        d = jnp.einsum("bc,sch->bsh", ctx, s)                     # (B, S, H)
        idx = jnp.argmax(jnp.abs(d), axis=1)                      # (B, H)
        sel = jnp.take_along_axis(d, idx[:, None, :], axis=1)[:, 0, :]
        gated = y * jax.nn.sigmoid(sel)
        thresh = -jnp.sort(-gated, axis=-1)[:, k - 1:k]           # k-th largest per row
        h = jnp.where(gated >= thresh, gated, 0.0)
    return h @ params["wo"] + params["bo"]


# ---------------------------------- main --------------------------------------
if __name__ == "__main__":
    key = jax.random.PRNGKey(0)
    kx, kc, kp = jax.random.split(key, 3)
    x = jax.random.normal(kx, (BATCH, INPUT_DIM), jnp.float32)
    context = jax.random.normal(kc, (BATCH, DIM_CONTEXT), jnp.float32)
    params = init_params(kp)

    out = custom_dendritic_mlp_forward(x, context, params)
    out = jax.block_until_ready(out)

    ref = jax.block_until_ready(reference_forward(x, context, params))
    np.testing.assert_allclose(np.asarray(out), np.asarray(ref), rtol=1e-3, atol=1e-3)

    print("KERNEL_OK")
</pallas_src>

<mosaic_0001>
module attributes {stable_mosaic.version = 11 : i64} {
  func.func @_dendritic_mlp_kernel(%arg0: i32, %arg1: memref<8x28xf32, #tpu.memory_space<vmem>>, %arg2: memref<28x64xf32, #tpu.memory_space<vmem>>, %arg3: memref<1x64xf32, #tpu.memory_space<vmem>>, %arg4: memref<16x32xf32, #tpu.memory_space<vmem>>, %arg5: memref<1x32xf32, #tpu.memory_space<vmem>>, %arg6: memref<32x32xf32, #tpu.memory_space<vmem>>, %arg7: memref<1x32xf32, #tpu.memory_space<vmem>>, %arg8: memref<64x256xf32, #tpu.memory_space<vmem>>, %arg9: memref<32x128xf32, #tpu.memory_space<vmem>>, %arg10: memref<1x128xf32, #tpu.memory_space<vmem>>, %arg11: memref<8x128xf32, #tpu.memory_space<vmem>>) attributes {dimension_semantics = [#tpu.dimension_semantics<parallel>], iteration_bounds = array<i64: 1>, scalar_prefetch = 0 : i64, scratch_operands = 0 : i64, tpu.core_type = #tpu.core_type<tc>, window_params = [{transform_indices = @transform_0, window_bounds = array<i64: 8, 28>}, {pipeline_mode = #tpu.pipeline_mode<synchronous>, transform_indices = @transform_1, window_bounds = array<i64: 28, 64>}, {pipeline_mode = #tpu.pipeline_mode<synchronous>, transform_indices = @transform_2, window_bounds = array<i64: 1, 64>}, {pipeline_mode = #tpu.pipeline_mode<synchronous>, transform_indices = @transform_3, window_bounds = array<i64: 16, 32>}, {pipeline_mode = #tpu.pipeline_mode<synchronous>, transform_indices = @transform_4, window_bounds = array<i64: 1, 32>}, {pipeline_mode = #tpu.pipeline_mode<synchronous>, transform_indices = @transform_5, window_bounds = array<i64: 32, 32>}, {pipeline_mode = #tpu.pipeline_mode<synchronous>, transform_indices = @transform_6, window_bounds = array<i64: 1, 32>}, {pipeline_mode = #tpu.pipeline_mode<synchronous>, transform_indices = @transform_7, window_bounds = array<i64: 64, 256>}, {pipeline_mode = #tpu.pipeline_mode<synchronous>, transform_indices = @transform_8, window_bounds = array<i64: 32, 128>}, {pipeline_mode = #tpu.pipeline_mode<synchronous>, transform_indices = @transform_9, window_bounds = array<i64: 1, 128>}, {transform_indices = @transform_10, window_bounds = array<i64: 8, 128>}]} {
    %c0 = arith.constant 0 : index
    %c0_0 = arith.constant 0 : index
    %0 = vector.load %arg1[%c0, %c0_0] : memref<8x28xf32, #tpu.memory_space<vmem>>, vector<8x28xf32>
    %1 = vector.extract_strided_slice %0 {offsets = [0, 0], sizes = [8, 16], strides = [1, 1]} : vector<8x28xf32> to vector<8x16xf32>
    %c0_1 = arith.constant 0 : index
    %c0_2 = arith.constant 0 : index
    %2 = vector.load %arg2[%c0_1, %c0_2] : memref<28x64xf32, #tpu.memory_space<vmem>>, vector<28x64xf32>
    %cst = arith.constant dense<0.000000e+00> : vector<8x64xf32>
    %3 = tpu.matmul %0, %2, %cst {dimension_numbers = #tpu.dot_dimension_numbers<[1], [0], [0], [1], [0, 0, 1, 1], [], []>} : vector<8x28xf32>, vector<28x64xf32>, vector<8x64xf32> -> vector<8x64xf32>
    %c0_3 = arith.constant 0 : index
    %c0_4 = arith.constant 0 : index
    %4 = vector.load %arg3[%c0_3, %c0_4] : memref<1x64xf32, #tpu.memory_space<vmem>>, vector<1x64xf32>
    %5 = vector.broadcast %4 : vector<1x64xf32> to vector<8x64xf32>
    %6 = arith.addf %3, %5 : vector<8x64xf32>
    %cst_5 = arith.constant 0.000000e+00 : f32
    %7 = vector.broadcast %cst_5 : f32 to vector<8x64xf32>
    %8 = arith.maximumf %6, %7 : vector<8x64xf32>
    %c0_6 = arith.constant 0 : index
    %c0_7 = arith.constant 0 : index
    %9 = vector.load %arg8[%c0_6, %c0_7] : memref<64x256xf32, #tpu.memory_space<vmem>>, vector<64x256xf32>
    %cst_8 = arith.constant dense<0.000000e+00> : vector<8x256xf32>
    %10 = tpu.matmul %8, %9, %cst_8 {dimension_numbers = #tpu.dot_dimension_numbers<[1], [0], [0], [1], [0, 0, 1, 1], [], []>} : vector<8x64xf32>, vector<64x256xf32>, vector<8x256xf32> -> vector<8x256xf32>
    %11 = vector.extract_strided_slice %10 {offsets = [0, 0], sizes = [8, 128], strides = [1, 1]} : vector<8x256xf32> to vector<8x128xf32>
    %c0_9 = arith.constant 0 : index
    %c0_10 = arith.constant 0 : index
    %12 = vector.load %arg4[%c0_9, %c0_10] : memref<16x32xf32, #tpu.memory_space<vmem>>, vector<16x32xf32>
    %cst_11 = arith.constant dense<0.000000e+00> : vector<8x32xf32>
    %13 = tpu.matmul %1, %12, %cst_11 {dimension_numbers = #tpu.dot_dimension_numbers<[1], [0], [0], [1], [0, 0, 1, 1], [], []>} : vector<8x16xf32>, vector<16x32xf32>, vector<8x32xf32> -> vector<8x32xf32>
    %c0_12 = arith.constant 0 : index
    %c0_13 = arith.constant 0 : index
    %14 = vector.load %arg5[%c0_12, %c0_13] : memref<1x32xf32, #tpu.memory_space<vmem>>, vector<1x32xf32>
    %15 = vector.broadcast %14 : vector<1x32xf32> to vector<8x32xf32>
    %16 = arith.addf %13, %15 : vector<8x32xf32>
    %17 = vector.extract_strided_slice %11 {offsets = [0, 0], sizes = [8, 32], strides = [1, 1]} : vector<8x128xf32> to vector<8x32xf32>
    %18 = math.absf %17 : vector<8x32xf32>
    %19 = vector.extract_strided_slice %11 {offsets = [0, 32], sizes = [8, 32], strides = [1, 1]} : vector<8x128xf32> to vector<8x32xf32>
    %20 = math.absf %19 : vector<8x32xf32>
    %21 = arith.cmpf ogt, %20, %18 : vector<8x32xf32>
    %22 = arith.select %21, %19, %17 : vector<8x32xi1>, vector<8x32xf32>
    %23 = arith.select %21, %20, %18 : vector<8x32xi1>, vector<8x32xf32>
    %24 = vector.extract_strided_slice %11 {offsets = [0, 64], sizes = [8, 32], strides = [1, 1]} : vector<8x128xf32> to vector<8x32xf32>
    %25 = math.absf %24 : vector<8x32xf32>
    %26 = arith.cmpf ogt, %25, %23 : vector<8x32xf32>
    %27 = arith.select %26, %24, %22 : vector<8x32xi1>, vector<8x32xf32>
    %28 = arith.select %26, %25, %23 : vector<8x32xi1>, vector<8x32xf32>
    %29 = vector.extract_strided_slice %11 {offsets = [0, 96], sizes = [8, 32], strides = [1, 1]} : vector<8x128xf32> to vector<8x32xf32>
    %30 = math.absf %29 : vector<8x32xf32>
    %31 = arith.cmpf ogt, %30, %28 : vector<8x32xf32>
    %32 = arith.select %31, %29, %27 : vector<8x32xi1>, vector<8x32xf32>
    %33 = arith.negf %32 : vector<8x32xf32>
    %34 = math.exp %33 : vector<8x32xf32>
    %cst_14 = arith.constant 1.000000e+00 : f32
    %35 = vector.broadcast %cst_14 : f32 to vector<8x32xf32>
    %36 = arith.addf %35, %34 : vector<8x32xf32>
    %37 = arith.divf %35, %36 : vector<8x32xf32>
    %38 = arith.mulf %16, %37 : vector<8x32xf32>
    %cst_15 = arith.constant dense<0xFF800000> : vector<8xf32>
    %39 = vector.multi_reduction <maximumf>, %38, %cst_15 [1] : vector<8x32xf32> to vector<8xf32>
    %40 = vector.shape_cast %39 : vector<8xf32> to vector<8x1xf32>
    %41 = vector.broadcast %40 : vector<8x1xf32> to vector<8x32xf32>
    %42 = arith.cmpf oge, %38, %41 : vector<8x32xf32>
    %cst_16 = arith.constant 0xFF800000 : f32
    %43 = vector.broadcast %cst_16 : f32 to vector<8x32xf32>
    %44 = arith.select %42, %43, %38 : vector<8x32xi1>, vector<8x32xf32>
    %cst_17 = arith.constant dense<0xFF800000> : vector<8xf32>
    %45 = vector.multi_reduction <maximumf>, %44, %cst_17 [1] : vector<8x32xf32> to vector<8xf32>
    %46 = vector.shape_cast %45 : vector<8xf32> to vector<8x1xf32>
    %47 = vector.broadcast %46 : vector<8x1xf32> to vector<8x32xf32>
    %48 = arith.cmpf oge, %44, %47 : vector<8x32xf32>
    %cst_18 = arith.constant 0xFF800000 : f32
    %49 = vector.broadcast %cst_18 : f32 to vector<8x32xf32>
    %50 = arith.select %48, %49, %44 : vector<8x32xi1>, vector<8x32xf32>
    %cst_19 = arith.constant dense<0xFF800000> : vector<8xf32>
    %51 = vector.multi_reduction <maximumf>, %50, %cst_19 [1] : vector<8x32xf32> to vector<8xf32>
    %52 = vector.shape_cast %51 : vector<8xf32> to vector<8x1xf32>
    %53 = vector.broadcast %52 : vector<8x1xf32> to vector<8x32xf32>
    %54 = arith.cmpf oge, %50, %53 : vector<8x32xf32>
    %cst_20 = arith.constant 0xFF800000 : f32
    %55 = vector.broadcast %cst_20 : f32 to vector<8x32xf32>
    %56 = arith.select %54, %55, %50 : vector<8x32xi1>, vector<8x32xf32>
    %cst_21 = arith.constant dense<0xFF800000> : vector<8xf32>
    %57 = vector.multi_reduction <maximumf>, %56, %cst_21 [1] : vector<8x32xf32> to vector<8xf32>
    %58 = vector.shape_cast %57 : vector<8xf32> to vector<8x1xf32>
    %59 = vector.broadcast %58 : vector<8x1xf32> to vector<8x32xf32>
    %60 = arith.cmpf oge, %56, %59 : vector<8x32xf32>
    %cst_22 = arith.constant 0xFF800000 : f32
    %61 = vector.broadcast %cst_22 : f32 to vector<8x32xf32>
    %62 = arith.select %60, %61, %56 : vector<8x32xi1>, vector<8x32xf32>
    %cst_23 = arith.constant dense<0xFF800000> : vector<8xf32>
    %63 = vector.multi_reduction <maximumf>, %62, %cst_23 [1] : vector<8x32xf32> to vector<8xf32>
    %64 = vector.shape_cast %63 : vector<8xf32> to vector<8x1xf32>
    %65 = vector.broadcast %64 : vector<8x1xf32> to vector<8x32xf32>
    %66 = arith.cmpf oge, %62, %65 : vector<8x32xf32>
    %cst_24 = arith.constant 0xFF800000 : f32
    %67 = vector.broadcast %cst_24 : f32 to vector<8x32xf32>
    %68 = arith.select %66, %67, %62 : vector<8x32xi1>, vector<8x32xf32>
    %cst_25 = arith.constant dense<0xFF800000> : vector<8xf32>
    %69 = vector.multi_reduction <maximumf>, %68, %cst_25 [1] : vector<8x32xf32> to vector<8xf32>
    %70 = vector.shape_cast %69 : vector<8xf32> to vector<8x1xf32>
    %71 = vector.broadcast %70 : vector<8x1xf32> to vector<8x32xf32>
    %72 = arith.cmpf oge, %68, %71 : vector<8x32xf32>
    %cst_26 = arith.constant 0xFF800000 : f32
    %73 = vector.broadcast %cst_26 : f32 to vector<8x32xf32>
    %74 = arith.select %72, %73, %68 : vector<8x32xi1>, vector<8x32xf32>
    %cst_27 = arith.constant dense<0xFF800000> : vector<8xf32>
    %75 = vector.multi_reduction <maximumf>, %74, %cst_27 [1] : vector<8x32xf32> to vector<8xf32>
    %76 = vector.shape_cast %75 : vector<8xf32> to vector<8x1xf32>
    %77 = vector.broadcast %76 : vector<8x1xf32> to vector<8x32xf32>
    %78 = arith.cmpf oge, %74, %77 : vector<8x32xf32>
    %cst_28 = arith.constant 0xFF800000 : f32
    %79 = vector.broadcast %cst_28 : f32 to vector<8x32xf32>
    %80 = arith.select %78, %79, %74 : vector<8x32xi1>, vector<8x32xf32>
    %cst_29 = arith.constant dense<0xFF800000> : vector<8xf32>
    %81 = vector.multi_reduction <maximumf>, %80, %cst_29 [1] : vector<8x32xf32> to vector<8xf32>
    %82 = vector.shape_cast %81 : vector<8xf32> to vector<8x1xf32>
    %83 = vector.broadcast %82 : vector<8x1xf32> to vector<8x32xf32>
    %84 = arith.cmpf oge, %38, %83 : vector<8x32xf32>
    %cst_30 = arith.constant 0.000000e+00 : f32
    %85 = vector.broadcast %cst_30 : f32 to vector<8x32xf32>
    %86 = arith.select %84, %38, %85 : vector<8x32xi1>, vector<8x32xf32>
    %87 = vector.extract_strided_slice %10 {offsets = [0, 128], sizes = [8, 128], strides = [1, 1]} : vector<8x256xf32> to vector<8x128xf32>
    %c0_31 = arith.constant 0 : index
    %c0_32 = arith.constant 0 : index
    %88 = vector.load %arg6[%c0_31, %c0_32] : memref<32x32xf32, #tpu.memory_space<vmem>>, vector<32x32xf32>
    %cst_33 = arith.constant dense<0.000000e+00> : vector<8x32xf32>
    %89 = tpu.matmul %86, %88, %cst_33 {dimension_numbers = #tpu.dot_dimension_numbers<[1], [0], [0], [1], [0, 0, 1, 1], [], []>} : vector<8x32xf32>, vector<32x32xf32>, vector<8x32xf32> -> vector<8x32xf32>
    %c0_34 = arith.constant 0 : index
    %c0_35 = arith.constant 0 : index
    %90 = vector.load %arg7[%c0_34, %c0_35] : memref<1x32xf32, #tpu.memory_space<vmem>>, vector<1x32xf32>
    %91 = vector.broadcast %90 : vector<1x32xf32> to vector<8x32xf32>
    %92 = arith.addf %89, %91 : vector<8x32xf32>
    %93 = vector.extract_strided_slice %87 {offsets = [0, 0], sizes = [8, 32], strides = [1, 1]} : vector<8x128xf32> to vector<8x32xf32>
    %94 = math.absf %93 : vector<8x32xf32>
    %95 = vector.extract_strided_slice %87 {offsets = [0, 32], sizes = [8, 32], strides = [1, 1]} : vector<8x128xf32> to vector<8x32xf32>
    %96 = math.absf %95 : vector<8x32xf32>
    %97 = arith.cmpf ogt, %96, %94 : vector<8x32xf32>
    %98 = arith.select %97, %95, %93 : vector<8x32xi1>, vector<8x32xf32>
    %99 = arith.select %97, %96, %94 : vector<8x32xi1>, vector<8x32xf32>
    %100 = vector.extract_strided_slice %87 {offsets = [0, 64], sizes = [8, 32], strides = [1, 1]} : vector<8x128xf32> to vector<8x32xf32>
    %101 = math.absf %100 : vector<8x32xf32>
    %102 = arith.cmpf ogt, %101, %99 : vector<8x32xf32>
    %103 = arith.select %102, %100, %98 : vector<8x32xi1>, vector<8x32xf32>
    %104 = arith.select %102, %101, %99 : vector<8x32xi1>, vector<8x32xf32>
    %105 = vector.extract_strided_slice %87 {offsets = [0, 96], sizes = [8, 32], strides = [1, 1]} : vector<8x128xf32> to vector<8x32xf32>
    %106 = math.absf %105 : vector<8x32xf32>
    %107 = arith.cmpf ogt, %106, %104 : vector<8x32xf32>
    %108 = arith.select %107, %105, %103 : vector<8x32xi1>, vector<8x32xf32>
    %109 = arith.negf %108 : vector<8x32xf32>
    %110 = math.exp %109 : vector<8x32xf32>
    %cst_36 = arith.constant 1.000000e+00 : f32
    %111 = vector.broadcast %cst_36 : f32 to vector<8x32xf32>
    %112 = arith.addf %111, %110 : vector<8x32xf32>
    %113 = arith.divf %111, %112 : vector<8x32xf32>
    %114 = arith.mulf %92, %113 : vector<8x32xf32>
    %cst_37 = arith.constant dense<0xFF800000> : vector<8xf32>
    %115 = vector.multi_reduction <maximumf>, %114, %cst_37 [1] : vector<8x32xf32> to vector<8xf32>
    %116 = vector.shape_cast %115 : vector<8xf32> to vector<8x1xf32>
    %117 = vector.broadcast %116 : vector<8x1xf32> to vector<8x32xf32>
    %118 = arith.cmpf oge, %114, %117 : vector<8x32xf32>
    %cst_38 = arith.constant 0xFF800000 : f32
    %119 = vector.broadcast %cst_38 : f32 to vector<8x32xf32>
    %120 = arith.select %118, %119, %114 : vector<8x32xi1>, vector<8x32xf32>
    %cst_39 = arith.constant dense<0xFF800000> : vector<8xf32>
    %121 = vector.multi_reduction <maximumf>, %120, %cst_39 [1] : vector<8x32xf32> to vector<8xf32>
    %122 = vector.shape_cast %121 : vector<8xf32> to vector<8x1xf32>
    %123 = vector.broadcast %122 : vector<8x1xf32> to vector<8x32xf32>
    %124 = arith.cmpf oge, %120, %123 : vector<8x32xf32>
    %cst_40 = arith.constant 0xFF800000 : f32
    %125 = vector.broadcast %cst_40 : f32 to vector<8x32xf32>
    %126 = arith.select %124, %125, %120 : vector<8x32xi1>, vector<8x32xf32>
    %cst_41 = arith.constant dense<0xFF800000> : vector<8xf32>
    %127 = vector.multi_reduction <maximumf>, %126, %cst_41 [1] : vector<8x32xf32> to vector<8xf32>
    %128 = vector.shape_cast %127 : vector<8xf32> to vector<8x1xf32>
    %129 = vector.broadcast %128 : vector<8x1xf32> to vector<8x32xf32>
    %130 = arith.cmpf oge, %126, %129 : vector<8x32xf32>
    %cst_42 = arith.constant 0xFF800000 : f32
    %131 = vector.broadcast %cst_42 : f32 to vector<8x32xf32>
    %132 = arith.select %130, %131, %126 : vector<8x32xi1>, vector<8x32xf32>
    %cst_43 = arith.constant dense<0xFF800000> : vector<8xf32>
    %133 = vector.multi_reduction <maximumf>, %132, %cst_43 [1] : vector<8x32xf32> to vector<8xf32>
    %134 = vector.shape_cast %133 : vector<8xf32> to vector<8x1xf32>
    %135 = vector.broadcast %134 : vector<8x1xf32> to vector<8x32xf32>
    %136 = arith.cmpf oge, %132, %135 : vector<8x32xf32>
    %cst_44 = arith.constant 0xFF800000 : f32
    %137 = vector.broadcast %cst_44 : f32 to vector<8x32xf32>
    %138 = arith.select %136, %137, %132 : vector<8x32xi1>, vector<8x32xf32>
    %cst_45 = arith.constant dense<0xFF800000> : vector<8xf32>
    %139 = vector.multi_reduction <maximumf>, %138, %cst_45 [1] : vector<8x32xf32> to vector<8xf32>
    %140 = vector.shape_cast %139 : vector<8xf32> to vector<8x1xf32>
    %141 = vector.broadcast %140 : vector<8x1xf32> to vector<8x32xf32>
    %142 = arith.cmpf oge, %138, %141 : vector<8x32xf32>
    %cst_46 = arith.constant 0xFF800000 : f32
    %143 = vector.broadcast %cst_46 : f32 to vector<8x32xf32>
    %144 = arith.select %142, %143, %138 : vector<8x32xi1>, vector<8x32xf32>
    %cst_47 = arith.constant dense<0xFF800000> : vector<8xf32>
    %145 = vector.multi_reduction <maximumf>, %144, %cst_47 [1] : vector<8x32xf32> to vector<8xf32>
    %146 = vector.shape_cast %145 : vector<8xf32> to vector<8x1xf32>
    %147 = vector.broadcast %146 : vector<8x1xf32> to vector<8x32xf32>
    %148 = arith.cmpf oge, %144, %147 : vector<8x32xf32>
    %cst_48 = arith.constant 0xFF800000 : f32
    %149 = vector.broadcast %cst_48 : f32 to vector<8x32xf32>
    %150 = arith.select %148, %149, %144 : vector<8x32xi1>, vector<8x32xf32>
    %cst_49 = arith.constant dense<0xFF800000> : vector<8xf32>
    %151 = vector.multi_reduction <maximumf>, %150, %cst_49 [1] : vector<8x32xf32> to vector<8xf32>
    %152 = vector.shape_cast %151 : vector<8xf32> to vector<8x1xf32>
    %153 = vector.broadcast %152 : vector<8x1xf32> to vector<8x32xf32>
    %154 = arith.cmpf oge, %150, %153 : vector<8x32xf32>
    %cst_50 = arith.constant 0xFF800000 : f32
    %155 = vector.broadcast %cst_50 : f32 to vector<8x32xf32>
    %156 = arith.select %154, %155, %150 : vector<8x32xi1>, vector<8x32xf32>
    %cst_51 = arith.constant dense<0xFF800000> : vector<8xf32>
    %157 = vector.multi_reduction <maximumf>, %156, %cst_51 [1] : vector<8x32xf32> to vector<8xf32>
    %158 = vector.shape_cast %157 : vector<8xf32> to vector<8x1xf32>
    %159 = vector.broadcast %158 : vector<8x1xf32> to vector<8x32xf32>
    %160 = arith.cmpf oge, %114, %159 : vector<8x32xf32>
    %cst_52 = arith.constant 0.000000e+00 : f32
    %161 = vector.broadcast %cst_52 : f32 to vector<8x32xf32>
    %162 = arith.select %160, %114, %161 : vector<8x32xi1>, vector<8x32xf32>
    %c0_53 = arith.constant 0 : index
    %c0_54 = arith.constant 0 : index
    %163 = vector.load %arg9[%c0_53, %c0_54] : memref<32x128xf32, #tpu.memory_space<vmem>>, vector<32x128xf32>
    %cst_55 = arith.constant dense<0.000000e+00> : vector<8x128xf32>
    %164 = tpu.matmul %162, %163, %cst_55 {dimension_numbers = #tpu.dot_dimension_numbers<[1], [0], [0], [1], [0, 0, 1, 1], [], []>} : vector<8x32xf32>, vector<32x128xf32>, vector<8x128xf32> -> vector<8x128xf32>
    %c0_56 = arith.constant 0 : index
    %c0_57 = arith.constant 0 : index
    %165 = vector.load %arg10[%c0_56, %c0_57] : memref<1x128xf32, #tpu.memory_space<vmem>>, vector<1x128xf32>
    %166 = vector.broadcast %165 : vector<1x128xf32> to vector<8x128xf32>
    %167 = arith.addf %164, %166 : vector<8x128xf32>
    %c0_58 = arith.constant 0 : index
    %c0_59 = arith.constant 0 : index
    %168 = vector.load %arg11[%c0_58, %c0_59] : memref<8x128xf32, #tpu.memory_space<vmem>>, vector<8x128xf32>
    tpu.vector_store %arg11[%c0_58, %c0_59], %167 {strides = array<i32>} : memref<8x128xf32, #tpu.memory_space<vmem>>, vector<8x128xf32>,
    return
  }
  func.func @transform_0(%arg0: i32) -> (i32, i32) {
    %c0_i32 = arith.constant 0 : i32
    %c0_i32_0 = arith.constant 0 : i32
    return %arg0, %c0_i32 : i32, i32
  }
  func.func @transform_1(%arg0: i32) -> (i32, i32) {
    %c0_i32 = arith.constant 0 : i32
    %c0_i32_0 = arith.constant 0 : i32
    %c0_i32_1 = arith.constant 0 : i32
    return %c0_i32, %c0_i32_0 : i32, i32
  }
  func.func @transform_2(%arg0: i32) -> (i32, i32) {
    %c0_i32 = arith.constant 0 : i32
    %c0_i32_0 = arith.constant 0 : i32
    %c0_i32_1 = arith.constant 0 : i32
    return %c0_i32, %c0_i32_0 : i32, i32
  }
  func.func @transform_3(%arg0: i32) -> (i32, i32) {
    %c0_i32 = arith.constant 0 : i32
    %c0_i32_0 = arith.constant 0 : i32
    %c0_i32_1 = arith.constant 0 : i32
    return %c0_i32, %c0_i32_0 : i32, i32
  }
  func.func @transform_4(%arg0: i32) -> (i32, i32) {
    %c0_i32 = arith.constant 0 : i32
    %c0_i32_0 = arith.constant 0 : i32
    %c0_i32_1 = arith.constant 0 : i32
    return %c0_i32, %c0_i32_0 : i32, i32
  }
  func.func @transform_5(%arg0: i32) -> (i32, i32) {
    %c0_i32 = arith.constant 0 : i32
    %c0_i32_0 = arith.constant 0 : i32
    %c0_i32_1 = arith.constant 0 : i32
    return %c0_i32, %c0_i32_0 : i32, i32
  }
  func.func @transform_6(%arg0: i32) -> (i32, i32) {
    %c0_i32 = arith.constant 0 : i32
    %c0_i32_0 = arith.constant 0 : i32
    %c0_i32_1 = arith.constant 0 : i32
    return %c0_i32, %c0_i32_0 : i32, i32
  }
  func.func @transform_7(%arg0: i32) -> (i32, i32) {
    %c0_i32 = arith.constant 0 : i32
    %c0_i32_0 = arith.constant 0 : i32
    %c0_i32_1 = arith.constant 0 : i32
    return %c0_i32, %c0_i32_0 : i32, i32
  }
  func.func @transform_8(%arg0: i32) -> (i32, i32) {
    %c0_i32 = arith.constant 0 : i32
    %c0_i32_0 = arith.constant 0 : i32
    %c0_i32_1 = arith.constant 0 : i32
    return %c0_i32, %c0_i32_0 : i32, i32
  }
  func.func @transform_9(%arg0: i32) -> (i32, i32) {
    %c0_i32 = arith.constant 0 : i32
    %c0_i32_0 = arith.constant 0 : i32
    %c0_i32_1 = arith.constant 0 : i32
    return %c0_i32, %c0_i32_0 : i32, i32
  }
  func.func @transform_10(%arg0: i32) -> (i32, i32) {
    %c0_i32 = arith.constant 0 : i32
    %c0_i32_0 = arith.constant 0 : i32
    return %arg0, %c0_i32 : i32, i32
  }
}

</mosaic_0001>

<bundles_post_ra>
// kernel: tpu_custom_call.1
= control target key start
LH: loop header
LB: loop body
LE: loop exit
PB: predicated region body
PF: predicated region fallthrough
CT: control target
= control target key end

     0   :  { %15 = vsyncpa [#allocation3], 0  ;;  %s1272_s0 = inlined_call_operand.hbm [shape: f32[8,28], index: 0, kind: input, shape index: {}]   ;;  %s1273_s1 = inlined_call_operand.hbm [shape: f32[28,64], index: 1, kind: input, shape index: {}]   ;;  %s1274_s2 = inlined_call_operand.vmem [shape: f32[1,64], index: 2, kind: input, shape index: {}]   ;;  %s1275_s3 = inlined_call_operand.hbm [shape: f32[16,32], index: 3, kind: input, shape index: {}]   ;;  %s1276_s4 = inlined_call_operand.vmem [shape: f32[1,32], index: 4, kind: input, shape index: {}]   ;;  %s1277_s5 = inlined_call_operand.hbm [shape: f32[32,32], index: 5, kind: input, shape index: {}]   ;;  %s1278_s6 = inlined_call_operand.vmem [shape: f32[1,32], index: 6, kind: input, shape index: {}]   ;;  %s1279_s7 = inlined_call_operand.hbm [shape: f32[64,256], index: 7, kind: input, shape index: {}]   ;;  %s1280_s8 = inlined_call_operand.hbm [shape: f32[32,128], index: 8, kind: input, shape index: {}]   ;;  %s1281_s9 = inlined_call_operand.vmem [shape: f32[1,128], index: 9, kind: input, shape index: {}]   ;;  %s1282_s10 = inlined_call_operand.hbm [shape: f32[8,128], index: 10, kind: output, shape index: {}]  }
   0x1   :  { %16 = vsyncpa [#allocation6], 0 }
   0x2   :  { %17 = vsyncpa [#allocation9], 0 }
   0x3   :  { %18 = vsyncpa [#allocation12], 0 }
   0x4   :  { %19 = vsyncpa [#allocation4], 0  ;;  %s1032_s13 = smov [#allocation5]   ;;  %s868_s17 = scalar_lea.hbm %s1273_s1, 512 }
   0x5   :  { %s35_s14 = sshll.u32 %s1032_s13, 4  ;;  %p869_p0 = scmp.ne.s32.totalorder %s1273_s1, %s868_s17  ;;  %s36_s14 = int_to_ptr.vmem [resolvable:$true] %s35_s14 }
   0x6   :  { %p872_p1 = scmp.lt.u32.totalorder %s868_s17, %s1273_s1 }
   0x8   :  { %p874_p2 = pnand %p872_p1, %p869_p0 }
   0xa   :  { %877 = shalt.err (!%p874_p2)
}
   0xb   :  { %s878_s22 = scalar_lea.vmem %s36_s14, 512  ;;  %p883_p4 = scmp.lt.s32.totalorder %s36_s14, %s36_s14 }
   0xc   :  { %p879_p3 = scmp.ne.s32.totalorder %s36_s14, %s878_s22  ;;  %p884_p5 = scmp.lt.s32.totalorder %s878_s22, %s878_s22 }
   0xe   :  { %p885_p6 = por %p884_p5, %p883_p4 }
  0x10   :  { %p886_p7 = pnand %p885_p6, %p879_p3 }
  0x12   :  { %889 = shalt.err (!%p886_p7)
}
  0x13   :  { %s1033_s23 = smov 128   ;;  %s1034_s24 = smov 8  }
  0x14   :  { %41 = dma.hbm_to_vmem [thread:$0]  %s1273_s1, 512, %s36_s14, [#allocation6], %s1033_s23, %s1033_s23, %s1034_s24  }
  0x15   :  { %s1035_s27 = smov [#allocation8]   ;;  %s1036_s29 = smov [#allocation2]  }
  0x16   :  { %s63_s28 = sshll.u32 %s1035_s27, 4  ;;  %s26_s30 = sshll.u32 %s1036_s29, 4  ;;  %s64_s28 = int_to_ptr.vmem [resolvable:$true] %s63_s28  ;;  %s27_s30 = int_to_ptr.vmem [resolvable:$true] %s26_s30 }
  0x17   :  { %s890_s13 = scalar_lea.hbm %s1277_s5, 512 }
  0x18   :  { %p891_p8 = scmp.ne.s32.totalorder %s1277_s5, %s890_s13  ;;  %p894_p9 = scmp.lt.u32.totalorder %s890_s13, %s1277_s5 }
  0x1a   :  { %p896_p10 = pnand %p894_p9, %p891_p8 }
  0x1c   :  { %899 = shalt.err (!%p896_p10)
}
  0x1d   :  { %s900_s1 = scalar_lea.vmem %s64_s28, 512  ;;  %p905_p12 = scmp.lt.s32.totalorder %s64_s28, %s64_s28 }
  0x1e   :  { %p901_p11 = scmp.ne.s32.totalorder %s64_s28, %s900_s1  ;;  %p906_p13 = scmp.lt.s32.totalorder %s900_s1, %s900_s1 }
  0x20   :  { %p907_p0 = por %p906_p13, %p905_p12 }
  0x22   :  { %p908_p1 = pnand %p907_p0, %p901_p11 }
  0x24   :  { %911 = shalt.err (!%p908_p1)
}
  0x25   :  { %69 = dma.hbm_to_vmem [thread:$0]  %s1277_s5, 512, %s64_s28, [#allocation9], %s1033_s23, %s1033_s23, %s1034_s24  }
  0x26   :  { %s912_s22 = scalar_lea.hbm %s1272_s0, 128 }
  0x27   :  { %p913_p2 = scmp.ne.s32.totalorder %s1272_s0, %s912_s22  ;;  %p916_p3 = scmp.lt.u32.totalorder %s912_s22, %s1272_s0 }
  0x29   :  { %p918_p4 = pnand %p916_p3, %p913_p2 }
  0x2b   :  { %921 = shalt.err (!%p918_p4)
}
  0x2c   :  { %s922_s11 = scalar_lea.vmem %s27_s30, 128  ;;  %p927_p6 = scmp.lt.s32.totalorder %s27_s30, %s27_s30 }
  0x2d   :  { %p923_p5 = scmp.ne.s32.totalorder %s27_s30, %s922_s11  ;;  %p928_p7 = scmp.lt.s32.totalorder %s922_s11, %s922_s11 }
  0x2f   :  { %p929_p8 = por %p928_p7, %p927_p6 }
  0x31   :  { %p930_p9 = pnand %p929_p8, %p923_p5 }
  0x33   :  { %933 = shalt.err (!%p930_p9)
}
  0x34   :  { %29 = dma.hbm_to_vmem [thread:$0]  %s1272_s0, 128, %s27_s30, [#allocation3]  }
  0x35   :  { %s1037_s12 = smov [#allocation7]   ;;  %s1038_s15 = smov [#allocation10]  }
  0x36   :  { %s49_s13 = sshll.u32 %s1037_s12, 4  ;;  %s77_s16 = sshll.u32 %s1038_s15, 4  ;;  %s50_s13 = int_to_ptr.vmem [resolvable:$true] %s49_s13  ;;  %s78_s16 = int_to_ptr.vmem [resolvable:$true] %s77_s16 }
  0x37   :  { %s934_s1 = scalar_lea.hbm %s1275_s3, 256 }
  0x38   :  { %p935_p10 = scmp.ne.s32.totalorder %s1275_s3, %s934_s1  ;;  %p938_p11 = scmp.lt.u32.totalorder %s934_s1, %s1275_s3 }
  0x3a   :  { %p940_p12 = pnand %p938_p11, %p935_p10 }
  0x3c   :  { %943 = shalt.err (!%p940_p12)
}
  0x3d   :  { %s944_s0 = scalar_lea.vmem %s50_s13, 256  ;;  %p949_p0 = scmp.lt.s32.totalorder %s50_s13, %s50_s13 }
  0x3e   :  { %p945_p13 = scmp.ne.s32.totalorder %s50_s13, %s944_s0  ;;  %p950_p1 = scmp.lt.s32.totalorder %s944_s0, %s944_s0 }
  0x40   :  { %p951_p2 = por %p950_p1, %p949_p0 }
  0x42   :  { %p952_p3 = pnand %p951_p2, %p945_p13 }
  0x44   :  { %955 = shalt.err (!%p952_p3)
}
  0x45   :  { %55 = dma.hbm_to_vmem [thread:$0]  %s1275_s3, 256, %s50_s13, [#allocation6], %s1033_s23, %s1033_s23, %s1034_s24  }
  0x46   :  { %s956_s27 = scalar_lea.hbm %s1279_s7, 2048 }
  0x47   :  { %p957_p4 = scmp.ne.s32.totalorder %s1279_s7, %s956_s27  ;;  %p960_p5 = scmp.lt.u32.totalorder %s956_s27, %s1279_s7 }
  0x49   :  { %p962_p6 = pnand %p960_p5, %p957_p4 }
  0x4b   :  { %965 = shalt.err (!%p962_p6)
}
  0x4c   :  { %s966_s12 = scalar_lea.vmem %s78_s16, 2048  ;;  %p971_p8 = scmp.lt.s32.totalorder %s78_s16, %s78_s16 }
  0x4d   :  { %p967_p7 = scmp.ne.s32.totalorder %s78_s16, %s966_s12  ;;  %p972_p9 = scmp.lt.s32.totalorder %s966_s12, %s966_s12 }
  0x4f   :  { %p973_p10 = por %p972_p9, %p971_p8 }
  0x51   :  { %p974_p11 = pnand %p973_p10, %p967_p7 }
  0x53   :  { %977 = shalt.err (!%p974_p11)
}
  0x54   :  { %s1039_s3 = smov 256   ;;  %s1040_s13 = smov 16  }
  0x55   :  { %83 = dma.hbm_to_vmem [thread:$0]  %s1279_s7, 2048, %s78_s16, [#allocation9], %s1039_s3, %s1039_s3, %s1040_s13  }
  0x56   :  { %s1041_s18 = smov [#allocation11]   ;;  %s978_s20 = scalar_lea.hbm %s1280_s8, 512 }
  0x57   :  { %s89_s1 = sshll.u32 %s1041_s18, 4  ;;  %p979_p12 = scmp.ne.s32.totalorder %s1280_s8, %s978_s20  ;;  %s90_s1 = int_to_ptr.vmem [resolvable:$true] %s89_s1 }
  0x58   :  { %p982_p13 = scmp.lt.u32.totalorder %s978_s20, %s1280_s8 }
  0x5a   :  { %p984_p0 = pnand %p982_p13, %p979_p12 }
  0x5c   :  { %987 = shalt.err (!%p984_p0)
}
  0x5d   :  { %s988_s25 = scalar_lea.vmem %s90_s1, 512  ;;  %p993_p2 = scmp.lt.s32.totalorder %s90_s1, %s90_s1 }
  0x5e   :  { %p989_p1 = scmp.ne.s32.totalorder %s90_s1, %s988_s25  ;;  %p994_p3 = scmp.lt.s32.totalorder %s988_s25, %s988_s25 }
  0x60   :  { %p995_p4 = por %p994_p3, %p993_p2 }
  0x62   :  { %p996_p5 = pnand %p995_p4, %p989_p1 }
  0x64   :  { %999 = shalt.err (!%p996_p5)
}
  0x65   :  { %95 = dma.hbm_to_vmem [thread:$0]  %s1280_s8, 512, %s90_s1, [#allocation12], %s1033_s23, %s1033_s23, %s1034_s24  }
  0x66   :  { %1022 = dma.done.wait [#allocation3], 128  }
  0x67   :  { %1023 = vsyncadd [#allocation3], 4294967168 }
  0x68   :  { %1024 = dma.done.wait [#allocation6], 768  }
  0x69   :  { %1025 = vsyncadd [#allocation6], 4294966528 }
  0x6a   :  { %1026 = dma.done.wait [#allocation9], 2560  }
  0x6b   :  { %1027 = vsyncadd [#allocation9], 4294964736 }
  0x6c   :  { %1028 = dma.done.wait [#allocation12], 512  }
  0x6d   :  { %1029 = vsyncadd [#allocation12], 4294966784  ;;  %v1042_v0 = vmov 0.0|0.0   ;;  %vm1043_vm0 = vmmov 0   ;;  %v1044_v1 = vmov 0.0   ;;  %vm132_vm1 = vcmask 1043456  }
  0x6e   :  { %806 = vmatprep.subr.bf16.mxu0 %v1042_v0  ;;  %774 = vmatprep.mubr.msk.f32.mxu0 %vm1043_vm0, %v1044_v1  ;;  %v117_v2 = vld [vmem:[#allocation5] sm:$0xff]  ;;  %v118_v3 = vld [vmem:[#allocation5 + $0x8] sm:$0xff]  ;;  %v119_v4 = vld [vmem:[#allocation5 + $0x10] sm:$0xff]  ;;  %vm1045_vm2 = vmmov 1   ;;  %vm128_vm4 = vcmask 228352   ;;  %vm223_vm5 = vcmask 523264  }
  0x6f   :  { %291 = vmatprep.mubr.f32.mxu1 %v1044_v1  ;;  %v807_v5 = vpack.c.bf16 %v118_v3, %v117_v2  ;;  %v120_v6 = vld [vmem:[#allocation5 + $0x18] sm:$0xf]  ;;  %vm1191_vm3 = vmpackc.low %vm132_vm1, %vm1045_vm2  ;;  %v210_v9 = vld [vmem:[#allocation10 + $0x18] sm:$0xff]  ;;  %s1046_s24 = smov 32   ;;  %vm307_vm6 = vcmask 130048   ;;  %vm424_vm10 = vcmask 261120  }
  0x70   :  { %v208_v8 = vld [vmem:[#allocation10 + $0x8] sm:$0xff]  ;;  %v207_v10 = vld [vmem:[#allocation10] sm:$0xff]  ;;  %v209_v11 = vld [vmem:[#allocation10 + $0x10] sm:$0xff]  ;;  %v810_v12 = vpack.c.bf16 %v120_v6, %v119_v4  ;;  %s1047_s11 = smov [#allocation13]  }
  0x71   :  { %808 = vmatpush3.bf16.msra.mxu0 %v807_v5  ;;  %v813_v13 = vpack.c.bf16 %v210_v9, %v208_v8  ;;  %v815_v14 = vpack.c.bf16 %v209_v11, %v207_v10  ;;  %v212_v15 = vld [vmem:[#allocation10 + $0x28] sm:$0xff]  ;;  %v214_v16 = vld [vmem:[#allocation10 + $0x38] sm:$0xff]  ;;  %v211_v17 = vld [vmem:[#allocation10 + $0x20] sm:$0xff]  ;;  %s724_s5 = sshll.u32 %s1047_s11, 4  ;;  %s725_s5 = int_to_ptr.vmem [resolvable:$true] %s724_s5 }
  0x72   :  { %809 = vmatprep.subr.bf16.mxu0 %v1042_v0  ;;  %v817_v18 = vpack.c.bf16 %v214_v16, %v212_v15  ;;  %v213_v19 = vld [vmem:[#allocation10 + $0x30] sm:$0xff]  ;;  %v216_v20 = vld [vmem:[#allocation10 + $0x48] sm:$0xff]  ;;  %v218_v21 = vld [vmem:[#allocation10 + $0x58] sm:$0xff]  ;;  %s1000_s28 = scalar_lea.vmem %s725_s5, 128  ;;  %p1005_p7 = scmp.lt.s32.totalorder %s725_s5, %s725_s5 }
  0x73   :  { %814 = vmatprep.subr.bf16.mxu1 %v813_v13  ;;  %v819_v22 = vpack.c.bf16 %v213_v19, %v211_v17  ;;  %v116_v23 = vld [vmem:[#allocation2] sm:$0xff]  ;;  %v821_v24 = vpack.c.bf16 %v218_v21, %v216_v20  ;;  %v215_v25 = vld [vmem:[#allocation10 + $0x40] sm:$0xff]  ;;  %v217_v26 = vld [vmem:[#allocation10 + $0x50] sm:$0xff]  ;;  %p1001_p6 = scmp.ne.s32.totalorder %s725_s5, %s1000_s28  ;;  %p1006_p8 = scmp.lt.s32.totalorder %s1000_s28, %s1000_s28 }
  0x74   :  { %816 = vmatpush1.bf16.msra.mxu1 %v815_v14  ;;  %v823_v27 = vpack.c.bf16 %v217_v26, %v215_v25  ;;  %v220_v28 = vld [vmem:[#allocation10 + $0x68] sm:$0xff]  ;;  %v222_v29 = vld [vmem:[#allocation10 + $0x78] sm:$0xff]  ;;  %v219_v31 = vld [vmem:[#allocation10 + $0x60] sm:$0xff] }
  0x75   :  { %812 = vmatpush3.bf16.msk.msra.mxu0 %vm1191_vm3, %v810_v12  ;;  %818 = vmatprep.subr.bf16.mxu1 %v817_v18  ;;  %v825_v30 = vpack.c.bf16 %v222_v29, %v220_v28  ;;  %v221_v32 = vld [vmem:[#allocation10 + $0x70] sm:$0xff]  ;;  %v736_v34 = vld [vmem:[%s1274_s2] ss:$0 sm:$0xff]  ;;  %v299_v43 = vld [vmem:[#allocation7 + $0x8] sm:$0xff]  ;;  %p1007_p9 = por %p1006_p8, %p1005_p7 }
  0x76   :  { %829 = vmatprep.subr.bf16.mxu0 %v1042_v0  ;;  %v827_v33 = vpack.c.bf16 %v221_v32, %v219_v31  ;;  %v298_v42 = vld [vmem:[#allocation7] sm:$0xff]  ;;  %v740_v62 = vld [vmem:[%s1276_s4] ss:$0 sm:$0xff] }
  0x77   :  { %v830_v44 = vpack.c.bf16 %v299_v43, %v298_v42  ;;  %v467_v25 = vld [vmem:[#allocation8 + $0x10] sm:$0xff]  ;;  %p1008_p10 = pnand %p1007_p9, %p1001_p6 }
  0x78   :  { %775 = vmatmul.mubr.msk.f32.vlgmr.msra.gmra.mrb[0].mxu0 %vm128_vm4, %v116_v23  ;;  %820 = vmatpush1.bf16.msra.mxu1 %v819_v22 }
  0x79   :  { %822 = vmatprep.subr.bf16.mxu1 %v821_v24  ;;  %781 = vmatprep.mubr.msk.f32.mxu0 %vm1043_vm0, %v1044_v1  ;;  %v466_v24 = vld [vmem:[#allocation8 + $0x8] sm:$0xff] }
  0x7a   :  { %831 = vmatpush3.bf16.msra.mxu0 %v830_v44 }
  0x7b   :  { %832 = vmatprep.subr.bf16.mxu0 %v1042_v0 }
  0x7c   :  { %824 = vmatpush1.bf16.msra.mxu1 %v823_v27  ;;  %v468_v27 = vld [vmem:[#allocation8 + $0x18] sm:$0xff] }
  0x7d   :  { %826 = vmatprep.subr.bf16.mxu1 %v825_v30  ;;  %782 = vmatmul.mubr.msk.f32.vlgmr.msra.gmra.mrb[2].mxu0 %vm307_vm6, %v116_v23  ;;  %v465_v23 = vld [vmem:[#allocation8] sm:$0xff]  ;;  %v836_v28 = vpack.c.bf16 %v468_v27, %v467_v25 }
  0x7e   :  { %792 = vmatprep.mubr.msk.f32.mxu0 %vm1043_vm0, %v1044_v1  ;;  %v833_v26 = vpack.c.bf16 %v466_v24, %v465_v23 }
  0x80   :  { %828 = vmatpush1.bf16.msra.mxu1 %v827_v33  ;;  %834 = vmatpush3.bf16.msra.mxu0 %v833_v26 }
  0x81   :  { %838 = vmatprep.subr.bf16.mxu1 %v1042_v0  ;;  %835 = vmatprep.subr.bf16.mxu0 %v1042_v0 }
  0x84   :  { %837 = vmatpush3.bf16.msra.mxu0 %v836_v28 }
 0x14b   :  { %v202_v35 = vpop.f32.mrb[0].mxu0 }
 0x14c   :  { %v203_v36 = vadd.f32 %v736_v34, %v202_v35  ;;  %v776_v37 = vpop.f32.mrb[1].mxu0 }
 0x14e   :  { %v206_v38 = vmax.f32 %v203_v36, 0.0 }
 0x150   :  { %739 = vmatmul.mubr.msk.f32.vlgmr.msra.gmra.mrb[0].mxu1 %vm223_vm5, %v206_v38  ;;  %v376_v53 = vpop.f32.mrb[2].mxu0 }
 0x151   :  { %803 = vmatprep.mubr.msk.f32.mxu1 %vm1043_vm0, %v1044_v1  ;;  %v783_v54 = vpop.f32.mrb[3].mxu0  ;;  %v377_v63 = vadd.f32 %v740_v62, %v376_v53 }
 0x223   :  { %v293_v39 = vpop.f32.mrb[0].mxu1 }
 0x224   :  { %v380_v40 = vand.u32 2147483647, %v293_v39  ;;  %v1207_v41 = vpop.f32.mrb[1].mxu1 }
 0x225   :  { %v549_v22 = vand.u32 2147483647, %v1207_v41 }
 0x226   :  { %382 = vrot.lane.b32.xlu0 %v380_v40, %s1046_s24 }
 0x22a   :  { %387 = vrot.lane.b32.xlu0 %v293_v39, %s1046_s24 }
 0x298   :  { %v383_v45 = vpop.permute.xlu0 %382 }
 0x299   :  { %vm385_vm7 = vcmp.gt.f32.partialorder %v380_v40, %v383_v45 }
 0x29a   :  { %v391_v46 = vsel %vm385_vm7, %v380_v40, %v383_v45 }
 0x29b   :  { %393 = vrot.lane.b32.xlu1 %v391_v46, %s1046_s24 }
 0x29c   :  { %v388_v47 = vpop.permute.xlu0 %387 }
 0x29d   :  { %v390_v48 = vsel %vm385_vm7, %v293_v39, %v388_v47 }
 0x29f   :  { %398 = vrot.lane.b32.xlu1 %v390_v48, %s1046_s24 }
 0x30d   :  { %v394_v49 = vpop.permute.xlu1 %393 }
 0x30e   :  { %vm396_vm8 = vcmp.gt.f32.partialorder %v380_v40, %v394_v49 }
 0x30f   :  { %v402_v50 = vsel %vm396_vm8, %v380_v40, %v394_v49 }
 0x310   :  { %404 = vrot.lane.b32.xlu0 %v402_v50, %s1046_s24 }
 0x311   :  { %v399_v51 = vpop.permute.xlu1 %398 }
 0x312   :  { %v401_v52 = vsel %vm396_vm8, %v293_v39, %v399_v51 }
 0x313   :  { %409 = vrot.lane.b32.xlu1 %v401_v52, %s1046_s24  ;;  %v743_v52 = vld [vmem:[%s1278_s6] ss:$0 sm:$0xff] }
 0x382   :  { %v405_v55 = vpop.permute.xlu0 %404 }
 0x383   :  { %vm407_vm9 = vcmp.gt.f32.partialorder %v380_v40, %v405_v55 }
 0x385   :  { %v410_v56 = vpop.permute.xlu1 %409 }
 0x386   :  { %v412_v57 = vsel %vm407_vm9, %v293_v39, %v410_v56 }
 0x387   :  { %v742_v58 = vmul.f32 -1.442695, %v412_v57 }
 0x389   :  { %860 = vpow2.f32 %v742_v58 }
 0x393   :  { %v861_v59 = vpop.eup %860 }
 0x394   :  { %v416_v60 = vadd.f32 1.0, %v861_v59 }
 0x396   :  { %862 = vrcp.f32 %v416_v60 }
 0x3a0   :  { %v863_v61 = vpop.eup %862 }
 0x3a1   :  { %420 = vrot.lane.b32.xlu0 %v863_v61, %s1046_s24 }
 0x413   :  { %v421_v1 = vpop.permute.xlu0 %420 }
 0x414   :  { %v423_v2 = vmul.f32 %v421_v1, %v377_v63 }
 0x416   :  { %v425_v3 = vsel %vm424_vm10, %v423_v2, -inf }
 0x417   :  { %426 = vmax.xlane.f32.xlu1 %v425_v3 }
 0x4a4   :  { %v427_v4 = vpop.xlane.xlu1 %426 }
 0x4a5   :  { %vm428_vm11 = vcmp.ge.f32.partialorder %v423_v2, %v427_v4 }
 0x4a6   :  { %v429_v5 = vsel %vm428_vm11, -inf, %v423_v2 }
 0x4a7   :  { %v430_v6 = vsel %vm424_vm10, %v429_v5, -inf }
 0x4a8   :  { %431 = vmax.xlane.f32.xlu0 %v430_v6 }
 0x535   :  { %v432_v7 = vpop.xlane.xlu0 %431 }
 0x536   :  { %vm433_vm12 = vcmp.ge.f32.partialorder %v429_v5, %v432_v7 }
 0x537   :  { %v434_v8 = vsel %vm433_vm12, -inf, %v429_v5 }
 0x538   :  { %v435_v9 = vsel %vm424_vm10, %v434_v8, -inf }
 0x539   :  { %436 = vmax.xlane.f32.xlu0 %v435_v9 }
 0x5c6   :  { %v437_v10 = vpop.xlane.xlu0 %436 }
 0x5c7   :  { %vm438_vm13 = vcmp.ge.f32.partialorder %v434_v8, %v437_v10 }
 0x5c8   :  { %v439_v11 = vsel %vm438_vm13, -inf, %v434_v8 }
 0x5c9   :  { %v440_v12 = vsel %vm424_vm10, %v439_v11, -inf }
 0x5ca   :  { %441 = vmax.xlane.f32.xlu1 %v440_v12  ;;  %v634_v12 = vld [vmem:[#allocation11 + $0x8] sm:$0xff] }
 0x657   :  { %v442_v13 = vpop.xlane.xlu1 %441 }
 0x658   :  { %vm443_vm14 = vcmp.ge.f32.partialorder %v439_v11, %v442_v13  ;;  %v635_v13 = vld [vmem:[#allocation11 + $0x10] sm:$0xff] }
 0x659   :  { %v444_v14 = vsel %vm443_vm14, -inf, %v439_v11  ;;  %v633_v11 = vld [vmem:[#allocation11] sm:$0xff] }
 0x65a   :  { %v445_v15 = vsel %vm424_vm10, %v444_v14, -inf }
 0x65b   :  { %446 = vmax.xlane.f32.xlu0 %v445_v15  ;;  %v636_v15 = vld [vmem:[#allocation11 + $0x18] sm:$0xff] }
 0x6e8   :  { %v447_v16 = vpop.xlane.xlu0 %446 }
 0x6e9   :  { %vm448_vm15 = vcmp.ge.f32.partialorder %v444_v14, %v447_v16  ;;  %v842_v16 = vpack.c.bf16 %v636_v15, %v635_v13 }
 0x6ea   :  { %v449_v17 = vsel %vm448_vm15, -inf, %v444_v14  ;;  %v839_v14 = vpack.c.bf16 %v634_v12, %v633_v11 }
 0x6eb   :  { %v450_v18 = vsel %vm424_vm10, %v449_v17, -inf }
 0x6ec   :  { %451 = vmax.xlane.f32.xlu1 %v450_v18  ;;  %840 = vmatpush3.bf16.msra.mxu1 %v839_v14 }
 0x6ed   :  { %841 = vmatprep.subr.bf16.mxu1 %v1042_v0 }
 0x6f0   :  { %843 = vmatpush3.bf16.msra.mxu1 %v842_v16 }
 0x779   :  { %v452_v19 = vpop.xlane.xlu1 %451 }
 0x77a   :  { %vm453_vm0 = vcmp.ge.f32.partialorder %v449_v17, %v452_v19 }
 0x77b   :  { %v454_v20 = vsel %vm453_vm0, -inf, %v449_v17 }
 0x77c   :  { %v455_v21 = vsel %vm424_vm10, %v454_v20, -inf }
 0x77d   :  { %456 = vmax.xlane.f32.xlu0 %v455_v21 }
 0x793   :  { %551 = vrot.lane.b32.xlu0 %v549_v22, %s1046_s24 }
 0x80a   :  { %v457_v29 = vpop.xlane.xlu0 %456 }
 0x80b   :  { %vm458_vm1 = vcmp.ge.f32.partialorder %v454_v20, %v457_v29 }
 0x80c   :  { %v459_v30 = vsel %vm458_vm1, -inf, %v454_v20 }
 0x80d   :  { %v460_v31 = vsel %vm424_vm10, %v459_v30, -inf }
 0x80e   :  { %461 = vmax.xlane.f32.xlu1 %v460_v31  ;;  %v552_v32 = vpop.permute.xlu0 %551 }
 0x80f   :  { %vm554_vm2 = vcmp.gt.f32.partialorder %v549_v22, %v552_v32 }
 0x810   :  { %v560_v33 = vsel %vm554_vm2, %v549_v22, %v552_v32 }
 0x81f   :  { %556 = vrot.lane.b32.xlu1 %v1207_v41, %s1046_s24 }
 0x823   :  { %562 = vrot.lane.b32.xlu1 %v560_v33, %s1046_s24 }
 0x89b   :  { %v462_v34 = vpop.xlane.xlu1 %461 }
 0x89c   :  { %vm463_vm3 = vcmp.ge.f32.partialorder %v423_v2, %v462_v34 }
 0x89d   :  { %v464_v35 = vsel %vm463_vm3, %v423_v2, 0.0 }
 0x89e   :  { %793 = vmatmul.mubr.msk.f32.vlgmr.msra.gmra.mrb[4].mxu0 %vm424_vm10, %v464_v35 }
 0x89f   :  { %v557_v36 = vpop.permute.xlu1 %556 }
 0x8a0   :  { %v559_v37 = vsel %vm554_vm2, %v1207_v41, %v557_v36 }
 0x8a1   :  { %567 = vrot.lane.b32.xlu0 %v559_v37, %s1046_s24 }
 0x8a3   :  { %v563_v38 = vpop.permute.xlu1 %562 }
 0x8a4   :  { %vm565_vm4 = vcmp.gt.f32.partialorder %v549_v22, %v563_v38 }
 0x8a5   :  { %v571_v39 = vsel %vm565_vm4, %v549_v22, %v563_v38 }
 0x8a6   :  { %573 = vrot.lane.b32.xlu1 %v571_v39, %s1046_s24 }
 0x913   :  { %v568_v40 = vpop.permute.xlu0 %567 }
 0x914   :  { %v570_v42 = vsel %vm565_vm4, %v1207_v41, %v568_v40 }
 0x915   :  { %578 = vrot.lane.b32.xlu0 %v570_v42, %s1046_s24 }
 0x918   :  { %v574_v45 = vpop.permute.xlu1 %573 }
 0x919   :  { %vm576_vm5 = vcmp.gt.f32.partialorder %v549_v22, %v574_v45  ;;  %v746_v22 = vld [vmem:[%s1281_s9] ss:$0 sm:$0xff] }
 0x971   :  { %v545_v43 = vpop.f32.mrb[4].mxu0 }
 0x972   :  { %v794_v44 = vpop.f32.mrb[5].mxu0  ;;  %v546_v53 = vadd.f32 %v743_v52, %v545_v43 }
 0x987   :  { %v579_v46 = vpop.permute.xlu0 %578 }
 0x988   :  { %v581_v47 = vsel %vm576_vm5, %v1207_v41, %v579_v46 }
 0x989   :  { %v745_v48 = vmul.f32 -1.442695, %v581_v47 }
 0x98b   :  { %864 = vpow2.f32 %v745_v48 }
 0x995   :  { %v865_v49 = vpop.eup %864 }
 0x996   :  { %v585_v50 = vadd.f32 1.0, %v865_v49 }
 0x998   :  { %866 = vrcp.f32 %v585_v50 }
 0x9a2   :  { %v867_v51 = vpop.eup %866 }
 0x9a3   :  { %589 = vrot.lane.b32.xlu1 %v867_v51, %s1046_s24 }
 0xa15   :  { %v590_v54 = vpop.permute.xlu1 %589 }
 0xa16   :  { %v592_v55 = vmul.f32 %v590_v54, %v546_v53 }
 0xa18   :  { %v593_v56 = vsel %vm424_vm10, %v592_v55, -inf }
 0xa19   :  { %594 = vmax.xlane.f32.xlu0 %v593_v56 }
 0xaa6   :  { %v595_v57 = vpop.xlane.xlu0 %594 }
 0xaa7   :  { %vm596_vm6 = vcmp.ge.f32.partialorder %v592_v55, %v595_v57 }
 0xaa8   :  { %v597_v41 = vsel %vm596_vm6, -inf, %v592_v55 }
 0xaa9   :  { %v598_v58 = vsel %vm424_vm10, %v597_v41, -inf }
 0xaaa   :  { %599 = vmax.xlane.f32.xlu1 %v598_v58 }
 0xb37   :  { %v600_v59 = vpop.xlane.xlu1 %599 }
 0xb38   :  { %vm601_vm7 = vcmp.ge.f32.partialorder %v597_v41, %v600_v59 }
 0xb39   :  { %v602_v60 = vsel %vm601_vm7, -inf, %v597_v41 }
 0xb3a   :  { %v603_v61 = vsel %vm424_vm10, %v602_v60, -inf }
 0xb3b   :  { %604 = vmax.xlane.f32.xlu0 %v603_v61 }
 0xbc8   :  { %v605_v62 = vpop.xlane.xlu0 %604 }
 0xbc9   :  { %vm606_vm8 = vcmp.ge.f32.partialorder %v602_v60, %v605_v62 }
 0xbca   :  { %v607_v63 = vsel %vm606_vm8, -inf, %v602_v60 }
 0xbcb   :  { %v608_v1 = vsel %vm424_vm10, %v607_v63, -inf }
 0xbcc   :  { %609 = vmax.xlane.f32.xlu0 %v608_v1 }
 0xc59   :  { %v610_v2 = vpop.xlane.xlu0 %609 }
 0xc5a   :  { %vm611_vm9 = vcmp.ge.f32.partialorder %v607_v63, %v610_v2 }
 0xc5b   :  { %v612_v3 = vsel %vm611_vm9, -inf, %v607_v63 }
 0xc5c   :  { %v613_v4 = vsel %vm424_vm10, %v612_v3, -inf }
 0xc5d   :  { %614 = vmax.xlane.f32.xlu1 %v613_v4 }
 0xcea   :  { %v615_v5 = vpop.xlane.xlu1 %614 }
 0xceb   :  { %vm616_vm11 = vcmp.ge.f32.partialorder %v612_v3, %v615_v5 }
 0xcec   :  { %v617_v6 = vsel %vm616_vm11, -inf, %v612_v3 }
 0xced   :  { %v618_v7 = vsel %vm424_vm10, %v617_v6, -inf }
 0xcee   :  { %619 = vmax.xlane.f32.xlu0 %v618_v7 }
 0xd7b   :  { %v620_v8 = vpop.xlane.xlu0 %619 }
 0xd7c   :  { %vm621_vm12 = vcmp.ge.f32.partialorder %v617_v6, %v620_v8 }
 0xd7d   :  { %v622_v9 = vsel %vm621_vm12, -inf, %v617_v6 }
 0xd7e   :  { %v623_v10 = vsel %vm424_vm10, %v622_v9, -inf }
 0xd7f   :  { %624 = vmax.xlane.f32.xlu1 %v623_v10 }
 0xe0c   :  { %v625_v17 = vpop.xlane.xlu1 %624 }
 0xe0d   :  { %vm626_vm13 = vcmp.ge.f32.partialorder %v622_v9, %v625_v17 }
 0xe0e   :  { %v627_v18 = vsel %vm626_vm13, -inf, %v622_v9 }
 0xe0f   :  { %v628_v19 = vsel %vm424_vm10, %v627_v18, -inf }
 0xe10   :  { %629 = vmax.xlane.f32.xlu0 %v628_v19 }
 0xe9d   :  { %v630_v20 = vpop.xlane.xlu0 %629 }
 0xe9e   :  { %vm631_vm14 = vcmp.ge.f32.partialorder %v592_v55, %v630_v20 }
 0xe9f   :  { %v632_v21 = vsel %vm631_vm14, %v592_v55, 0.0 }
 0xea0   :  { %804 = vmatmul.mubr.msk.f32.vlgmr.msra.gmra.mrb[2].mxu1 %vm424_vm10, %v632_v21 }
 0xf73   :  { %v713_v23 = vpop.f32.mrb[2].mxu1 }
 0xf74   :  { %v714_v0 = vadd.f32 %v746_v22, %v713_v23  ;;  %v805_v24 = vpop.f32.mrb[3].mxu1 }
 0xf76   :  { %717 = vst [vmem:[#allocation13] sm:$0xff] %v714_v0 }
 0xf77   :  { %1011 = shalt.err (!%p1008_p10)
}
 0xf78   :  { %s1012_s13 = scalar_lea.hbm %s1282_s10, 128 }
 0xf79   :  { %p1013_p11 = scmp.ne.s32.totalorder %s1282_s10, %s1012_s13  ;;  %p1016_p12 = scmp.lt.u32.totalorder %s1012_s13, %s1282_s10 }
 0xf7b   :  { %p1018_p13 = pnand %p1016_p12, %p1013_p11 }
 0xf7d   :  { %1021 = shalt.err (!%p1018_p13)
}
 0xf7e   :  { %727 = dma.vmem_to_hbm [thread:$0]  %s725_s5, 128, %s1282_s10, [#allocation4]  }
 0xf7f   :  { %1030 = dma.done.wait [#allocation4], 128  }
 0xf80   :  { %1031 = vsyncadd [#allocation4], 4294967168 }
 0xf81   :  { %731 = vsyncpa [#allocation3], 1 }
 0xf82   :  { %732 = vsyncpa [#allocation6], 1 }
 0xf83   :  { %733 = vsyncpa [#allocation9], 1 }
 0xf84   :  { %734 = vsyncpa [#allocation12], 1 }
 0xf85   :  { %735 = vsyncpa [#allocation4], 1 }

</bundles_post_ra>
